<compile_context>
chip_gen: v7x
topology: tpu7x:2x2x1
jax: 0.10.0
libtpu: 0.0.40
codegen_flags: <defaults>
</compile_context>

<pallas_src>
import functools

import jax
import jax.numpy as jnp
from jax import lax
from jax.experimental import pallas as pl
from jax.experimental.pallas import tpu as pltpu


def _basic_block_kernel(x_ref, w1_ref, w2_ref, bn_ref, o_ref, xp1, xp2, col,
                        *, H, W, C, Cpad, PP, OFF):
    """Fully fused BasicBlock forward for one batch element.

    x_ref : (1, C, PP)        f32  pitched-flattened input (row pitch W+1, lane
                                   dim rounded up to a multiple of 128)
    w1_ref: (C, 9*Cpad)       f32  conv1 weights as an im2col matrix
    w2_ref: (C, 9*Cpad)       f32  conv2 weights as an im2col matrix
    bn_ref: (C, 4)            f32  folded BN params, columns = [s1, b1, s2, b2]
    o_ref : (1, C, PP)        f32  pitched output (wrapper strips pad columns)
    xp1/xp2: (C, PADP)        f32  zero-padded staging of conv1 / conv2 input
    col   : (9*Cpad, PP)      f32  im2col scratch (K axis = tap-major channels)
    """
    Wp = W + 1
    Pp = H * Wp

    @pl.when(pl.program_id(0) == 0)
    def _init():
        # Zero once: the halo lanes of the padded inputs and the channel-pad
        # rows of the im2col scratch.  The interiors are rewritten every step.
        xp1[...] = jnp.zeros_like(xp1)
        xp2[...] = jnp.zeros_like(xp2)
        col[...] = jnp.zeros_like(col)

    def conv3x3(xp_ref, w_ref):
        # Pack the 9 statically shifted windows along the contraction axis,
        # then a single (C, 9*Cpad) x (9*Cpad, PP) MXU dot with f32 accumulate.
        for t in range(9):                               # static, unrolled
            ky, kx = divmod(t, 3)
            start = OFF + (ky - 1) * Wp + (kx - 1)       # static lane offset
            col[pl.ds(t * Cpad, C), :] = xp_ref[:, pl.ds(start, PP)]
        return jnp.dot(w_ref[...], col[...], preferred_element_type=jnp.float32)

    bn = bn_ref[...]
    s1, b1 = bn[:, 0:1], bn[:, 1:2]
    s2, b2 = bn[:, 2:3], bn[:, 3:4]

    # Lanes holding real pixels (not the per-row pad column, not the round-up
    # tail).  Only needed to re-zero y1 before it becomes conv2's padded input.
    lane = lax.broadcasted_iota(jnp.int32, (1, PP), 1)
    keep = jnp.logical_and(lane % Wp != W, lane < Pp)

    x = x_ref[0]                                         # (C, PP) f32, pitched

    # ---- conv1 -> bn1 -> relu (input staged into zero-padded scratch) ----
    xp1[:, pl.ds(OFF, PP)] = x
    y1 = jnp.maximum(conv3x3(xp1, w1_ref) * s1 + b1, 0.0)
    y1 = jnp.where(keep, y1, 0.0)

    # ---- conv2 -> bn2 -> (+ identity) -> relu; y1 never leaves VMEM ----
    xp2[:, pl.ds(OFF, PP)] = y1
    out = conv3x3(xp2, w2_ref) * s2 + b2 + x             # identity residual
    o_ref[0] = jnp.maximum(out, 0.0)


def _fold_bn(gamma, beta, mean, var, eps=1e-5):
    scale = gamma / jnp.sqrt(var + eps)
    return scale, beta - mean * scale


def _round_up(x, m):
    return ((x + m - 1) // m) * m


def basic_block_forward(x_nchw, params):
    """Pallas BasicBlock forward (stride=1, downsample=None, Cin == Cout)."""
    N, C, H, W = x_nchw.shape
    assert params["conv1_w"].shape == (C, C, 3, 3)
    assert params["conv2_w"].shape == (C, C, 3, 3)

    Wp = W + 1                        # row pitch: one shared zero column / row
    Pp = H * Wp                       # pitched flat spatial size
    PP = _round_up(Pp, 128)           # lane-dense block width
    OFF = 128                         # aligned lane offset of image start
    assert Wp + 1 <= OFF, "image width too large for fixed halo offset"
    PADP = _round_up(OFF + PP + Wp + 1, 128)
    Cpad = _round_up(C, 8)            # sublane-aligned per-tap channel block

    # ---- input: pitched + lane-padded flat layout (channels on sublanes) ----
    x_p = jnp.pad(x_nchw.astype(jnp.float32),
                  ((0, 0), (0, 0), (0, 0), (0, 1)))              # (N,C,H,Wp)
    x_flat = jnp.pad(x_p.reshape(N, C, Pp),
                     ((0, 0), (0, 0), (0, PP - Pp)))             # (N,C,PP)

    # ---- weights: (Cout,Cin,3,3) -> (Cout, 9*Cpad), tap-major, Cin padded ----
    def to_mat(w):
        co = w.shape[0]
        wt = jnp.transpose(w, (0, 2, 3, 1)).reshape(co, 9, C)    # [co, tap, cin]
        wt = jnp.pad(wt, ((0, 0), (0, 0), (0, Cpad - C)))
        return wt.reshape(co, 9 * Cpad).astype(jnp.float32)

    w1 = to_mat(params["conv1_w"])
    w2 = to_mat(params["conv2_w"])

    s1, b1 = _fold_bn(params["bn1_gamma"], params["bn1_beta"],
                      params["bn1_mean"], params["bn1_var"])
    s2, b2 = _fold_bn(params["bn2_gamma"], params["bn2_beta"],
                      params["bn2_mean"], params["bn2_var"])
    bn = jnp.stack([s1, b1, s2, b2], axis=1).astype(jnp.float32)  # (C, 4)

    kernel = functools.partial(_basic_block_kernel, H=H, W=W, C=C,
                               Cpad=Cpad, PP=PP, OFF=OFF)

    out_flat = pl.pallas_call(
        kernel,
        out_shape=jax.ShapeDtypeStruct((N, C, PP), jnp.float32),
        grid_spec=pltpu.PrefetchScalarGridSpec(
            num_scalar_prefetch=0,
            grid=(N,),
            in_specs=[
                pl.BlockSpec((1, C, PP), lambda n: (n, 0, 0)),        # x
                pl.BlockSpec((C, 9 * Cpad), lambda n: (0, 0)),        # conv1 W
                pl.BlockSpec((C, 9 * Cpad), lambda n: (0, 0)),        # conv2 W
                pl.BlockSpec((C, 4), lambda n: (0, 0)),               # folded BN
            ],
            out_specs=pl.BlockSpec((1, C, PP), lambda n: (n, 0, 0)),
            scratch_shapes=[
                pltpu.VMEM((C, PADP), jnp.float32),        # padded conv1 input
                pltpu.VMEM((C, PADP), jnp.float32),        # padded conv2 input
                pltpu.VMEM((9 * Cpad, PP), jnp.float32),   # im2col scratch
            ],
        ),
        # "arbitrary": the scratch halos are zeroed once at program_id==0, so
        # the batch axis must run sequentially on a single core.
        compiler_params=pltpu.CompilerParams(
            dimension_semantics=("arbitrary",)),
    )(x_flat, w1, w2, bn)

    # Strip the round-up tail and the per-row pad column.
    out = out_flat[:, :, :Pp].reshape(N, C, H, Wp)[..., :W]
    return out


# ---------------- pure-JAX reference (for correctness check) ----------------
def _ref_forward(x_nchw, params):
    prec = lax.Precision.HIGHEST

    def conv3x3(x, w):
        return lax.conv_general_dilated(
            x, w, window_strides=(1, 1), padding=((1, 1), (1, 1)),
            dimension_numbers=("NCHW", "OIHW", "NCHW"), precision=prec)

    def bn(x, g, b, m, v, eps=1e-5):
        g = g[None, :, None, None]; b = b[None, :, None, None]
        m = m[None, :, None, None]; v = v[None, :, None, None]
        return (x - m) / jnp.sqrt(v + eps) * g + b

    out = conv3x3(x_nchw, params["conv1_w"])
    out = bn(out, params["bn1_gamma"], params["bn1_beta"],
             params["bn1_mean"], params["bn1_var"])
    out = jnp.maximum(out, 0.0)
    out = conv3x3(out, params["conv2_w"])
    out = bn(out, params["bn2_gamma"], params["bn2_beta"],
             params["bn2_mean"], params["bn2_var"])
    out = out + x_nchw
    return jnp.maximum(out, 0.0)


if __name__ == "__main__":
    N, C, H, W = 2, 4, 16, 16   # in_channels == out_channels, stride=1
    key = jax.random.PRNGKey(0)
    kx, k1, k2, kg1, kb1, kg2, kb2, km1, kv1, km2, kv2 = jax.random.split(key, 11)

    x = jax.random.normal(kx, (N, C, H, W), jnp.float32)
    params = {
        "conv1_w": 0.1 * jax.random.normal(k1, (C, C, 3, 3), jnp.float32),
        "conv2_w": 0.1 * jax.random.normal(k2, (C, C, 3, 3), jnp.float32),
        "bn1_gamma": 1.0 + 0.1 * jax.random.normal(kg1, (C,), jnp.float32),
        "bn1_beta": 0.1 * jax.random.normal(kb1, (C,), jnp.float32),
        "bn1_mean": 0.1 * jax.random.normal(km1, (C,), jnp.float32),
        "bn1_var": jnp.abs(1.0 + 0.1 * jax.random.normal(kv1, (C,), jnp.float32)),
        "bn2_gamma": 1.0 + 0.1 * jax.random.normal(kg2, (C,), jnp.float32),
        "bn2_beta": 0.1 * jax.random.normal(kb2, (C,), jnp.float32),
        "bn2_mean": 0.1 * jax.random.normal(km2, (C,), jnp.float32),
        "bn2_var": jnp.abs(1.0 + 0.1 * jax.random.normal(kv2, (C,), jnp.float32)),
    }

    out = jax.jit(basic_block_forward)(x, params)
    out = jax.block_until_ready(out)
    assert out.shape == (N, C, H, W)
    assert out.dtype == jnp.float32

    ref = _ref_forward(x, params)
    max_err = jnp.max(jnp.abs(out - ref))
    # Tolerance covers the (platform-dependent) f32 matmul pass decomposition
    # inside the MXU; genuine indexing / halo bugs would show errors O(0.1..1).
    assert jnp.allclose(out, ref, atol=5e-3, rtol=5e-3), f"max abs err {max_err}"

    print("KERNEL_OK")
</pallas_src>

<mosaic_0001>
module attributes {stable_mosaic.version = 11 : i64} {
  func.func @_basic_block_kernel(%arg0: i32, %arg1: memref<1x4x384xf32, #tpu.memory_space<vmem>>, %arg2: memref<4x72xf32, #tpu.memory_space<vmem>>, %arg3: memref<4x72xf32, #tpu.memory_space<vmem>>, %arg4: memref<4x4xf32, #tpu.memory_space<vmem>>, %arg5: memref<1x4x384xf32, #tpu.memory_space<vmem>>, %arg6: memref<4x640xf32, #tpu.memory_space<vmem>>, %arg7: memref<4x640xf32, #tpu.memory_space<vmem>>, %arg8: memref<72x384xf32, #tpu.memory_space<vmem>>) attributes {dimension_semantics = [#tpu.dimension_semantics<arbitrary>], iteration_bounds = array<i64: 2>, scalar_prefetch = 0 : i64, scratch_operands = 3 : i64, tpu.core_type = #tpu.core_type<tc>, window_params = [{transform_indices = @transform_0, window_bounds = array<i64: 1, 4, 384>}, {pipeline_mode = #tpu.pipeline_mode<synchronous>, transform_indices = @transform_1, window_bounds = array<i64: 4, 72>}, {pipeline_mode = #tpu.pipeline_mode<synchronous>, transform_indices = @transform_2, window_bounds = array<i64: 4, 72>}, {pipeline_mode = #tpu.pipeline_mode<synchronous>, transform_indices = @transform_3, window_bounds = array<i64: 4, 4>}, {transform_indices = @transform_4, window_bounds = array<i64: 1, 4, 384>}]} {
    %c0_i32 = arith.constant 0 : i32
    %0 = arith.cmpi eq, %arg0, %c0_i32 : i32
    %1 = arith.extui %0 : i1 to i32
    %c0_i32_0 = arith.constant 0 : i32
    %2 = arith.cmpi ne, %1, %c0_i32_0 : i32
    scf.if %2 {
      %cst_83 = arith.constant 0.000000e+00 : f32
      %96 = vector.broadcast %cst_83 : f32 to vector<4x640xf32>
      %c0_84 = arith.constant 0 : index
      %c0_85 = arith.constant 0 : index
      %97 = vector.load %arg6[%c0_84, %c0_85] : memref<4x640xf32, #tpu.memory_space<vmem>>, vector<4x640xf32>
      tpu.vector_store %arg6[%c0_84, %c0_85], %96 {strides = array<i32>} : memref<4x640xf32, #tpu.memory_space<vmem>>, vector<4x640xf32>,
      %cst_86 = arith.constant 0.000000e+00 : f32
      %98 = vector.broadcast %cst_86 : f32 to vector<4x640xf32>
      %c0_87 = arith.constant 0 : index
      %c0_88 = arith.constant 0 : index
      %99 = vector.load %arg7[%c0_87, %c0_88] : memref<4x640xf32, #tpu.memory_space<vmem>>, vector<4x640xf32>
      tpu.vector_store %arg7[%c0_87, %c0_88], %98 {strides = array<i32>} : memref<4x640xf32, #tpu.memory_space<vmem>>, vector<4x640xf32>,
      %cst_89 = arith.constant 0.000000e+00 : f32
      %100 = vector.broadcast %cst_89 : f32 to vector<72x384xf32>
      %c0_90 = arith.constant 0 : index
      %c0_91 = arith.constant 0 : index
      %101 = vector.load %arg8[%c0_90, %c0_91] : memref<72x384xf32, #tpu.memory_space<vmem>>, vector<72x384xf32>
      tpu.vector_store %arg8[%c0_90, %c0_91], %100 {strides = array<i32>} : memref<72x384xf32, #tpu.memory_space<vmem>>, vector<72x384xf32>,
    } else {
    }
    %c0 = arith.constant 0 : index
    %c0_1 = arith.constant 0 : index
    %3 = vector.load %arg4[%c0, %c0_1] : memref<4x4xf32, #tpu.memory_space<vmem>>, vector<4x4xf32>
    %4 = vector.extract_strided_slice %3 {offsets = [0, 0], sizes = [4, 1], strides = [1, 1]} : vector<4x4xf32> to vector<4x1xf32>
    %5 = vector.extract_strided_slice %3 {offsets = [0, 1], sizes = [4, 1], strides = [1, 1]} : vector<4x4xf32> to vector<4x1xf32>
    %6 = vector.extract_strided_slice %3 {offsets = [0, 2], sizes = [4, 1], strides = [1, 1]} : vector<4x4xf32> to vector<4x1xf32>
    %7 = vector.extract_strided_slice %3 {offsets = [0, 3], sizes = [4, 1], strides = [1, 1]} : vector<4x4xf32> to vector<4x1xf32>
    %8 = tpu.iota {dimensions = array<i32: 1>} : vector<1x384xi32>
    %c17_i32 = arith.constant 17 : i32
    %c0_i32_2 = arith.constant 0 : i32
    %9 = arith.cmpi eq, %c17_i32, %c0_i32_2 : i32
    %c1_i32 = arith.constant 1 : i32
    %10 = arith.select %9, %c1_i32, %c17_i32 : i32
    %11 = vector.broadcast %10 : i32 to vector<1x384xi32>
    %12 = arith.remsi %8, %11 : vector<1x384xi32>
    %c0_i32_3 = arith.constant 0 : i32
    %13 = vector.broadcast %c0_i32_3 : i32 to vector<1x384xi32>
    %14 = arith.cmpi ne, %12, %13 : vector<1x384xi32>
    %c0_i32_4 = arith.constant 0 : i32
    %15 = vector.broadcast %c0_i32_4 : i32 to vector<1x384xi32>
    %16 = arith.cmpi slt, %12, %15 : vector<1x384xi32>
    %c0_i32_5 = arith.constant 0 : i32
    %17 = arith.cmpi slt, %10, %c0_i32_5 : i32
    %18 = vector.broadcast %17 : i1 to vector<1x384xi1>
    %19 = vector.broadcast %18 : vector<1x384xi1> to vector<1x384xi1>
    %20 = arith.xori %16, %19 : vector<1x384xi1>
    %21 = arith.andi %20, %14 : vector<1x384xi1>
    %22 = vector.broadcast %10 : i32 to vector<1x384xi32>
    %23 = arith.addi %12, %22 : vector<1x384xi32>
    %24 = arith.select %21, %23, %12 : vector<1x384xi1>, vector<1x384xi32>
    %c16_i32 = arith.constant 16 : i32
    %25 = vector.broadcast %c16_i32 : i32 to vector<1x384xi32>
    %26 = arith.cmpi ne, %24, %25 : vector<1x384xi32>
    %c272_i32 = arith.constant 272 : i32
    %27 = vector.broadcast %c272_i32 : i32 to vector<1x384xi32>
    %28 = arith.cmpi slt, %8, %27 : vector<1x384xi32>
    %29 = arith.andi %26, %28 : vector<1x384xi1>
    %c0_6 = arith.constant 0 : index
    %c0_7 = arith.constant 0 : index
    %c0_8 = arith.constant 0 : index
    %30 = vector.load %arg1[%c0_6, %c0_7, %c0_8] : memref<1x4x384xf32, #tpu.memory_space<vmem>>, vector<1x4x384xf32>
    %31 = vector.shape_cast %30 : vector<1x4x384xf32> to vector<4x384xf32>
    %c0_9 = arith.constant 0 : index
    %c128 = arith.constant 128 : index
    %32 = vector.load %arg6[%c0_9, %c128] : memref<4x640xf32, #tpu.memory_space<vmem>>, vector<4x384xf32>
    tpu.vector_store %arg6[%c0_9, %c128], %31 {strides = array<i32>} : memref<4x640xf32, #tpu.memory_space<vmem>>, vector<4x384xf32>,
    %c0_10 = arith.constant 0 : index
    %c110 = arith.constant 110 : index
    %33 = vector.load %arg6[%c0_10, %c110] : memref<4x640xf32, #tpu.memory_space<vmem>>, vector<4x384xf32>
    %c0_11 = arith.constant 0 : index
    %c0_12 = arith.constant 0 : index
    %34 = vector.load %arg8[%c0_11, %c0_12] : memref<72x384xf32, #tpu.memory_space<vmem>>, vector<4x384xf32>
    tpu.vector_store %arg8[%c0_11, %c0_12], %33 {strides = array<i32>} : memref<72x384xf32, #tpu.memory_space<vmem>>, vector<4x384xf32>,
    %c0_13 = arith.constant 0 : index
    %c111 = arith.constant 111 : index
    %35 = vector.load %arg6[%c0_13, %c111] : memref<4x640xf32, #tpu.memory_space<vmem>>, vector<4x384xf32>
    %c8 = arith.constant 8 : index
    %c0_14 = arith.constant 0 : index
    %36 = vector.load %arg8[%c8, %c0_14] : memref<72x384xf32, #tpu.memory_space<vmem>>, vector<4x384xf32>
    tpu.vector_store %arg8[%c8, %c0_14], %35 {strides = array<i32>} : memref<72x384xf32, #tpu.memory_space<vmem>>, vector<4x384xf32>,
    %c0_15 = arith.constant 0 : index
    %c112 = arith.constant 112 : index
    %37 = vector.load %arg6[%c0_15, %c112] : memref<4x640xf32, #tpu.memory_space<vmem>>, vector<4x384xf32>
    %c16 = arith.constant 16 : index
    %c0_16 = arith.constant 0 : index
    %38 = vector.load %arg8[%c16, %c0_16] : memref<72x384xf32, #tpu.memory_space<vmem>>, vector<4x384xf32>
    tpu.vector_store %arg8[%c16, %c0_16], %37 {strides = array<i32>} : memref<72x384xf32, #tpu.memory_space<vmem>>, vector<4x384xf32>,
    %c0_17 = arith.constant 0 : index
    %c127 = arith.constant 127 : index
    %39 = vector.load %arg6[%c0_17, %c127] : memref<4x640xf32, #tpu.memory_space<vmem>>, vector<4x384xf32>
    %c24 = arith.constant 24 : index
    %c0_18 = arith.constant 0 : index
    %40 = vector.load %arg8[%c24, %c0_18] : memref<72x384xf32, #tpu.memory_space<vmem>>, vector<4x384xf32>
    tpu.vector_store %arg8[%c24, %c0_18], %39 {strides = array<i32>} : memref<72x384xf32, #tpu.memory_space<vmem>>, vector<4x384xf32>,
    %c0_19 = arith.constant 0 : index
    %c128_20 = arith.constant 128 : index
    %41 = vector.load %arg6[%c0_19, %c128_20] : memref<4x640xf32, #tpu.memory_space<vmem>>, vector<4x384xf32>
    %c32 = arith.constant 32 : index
    %c0_21 = arith.constant 0 : index
    %42 = vector.load %arg8[%c32, %c0_21] : memref<72x384xf32, #tpu.memory_space<vmem>>, vector<4x384xf32>
    tpu.vector_store %arg8[%c32, %c0_21], %41 {strides = array<i32>} : memref<72x384xf32, #tpu.memory_space<vmem>>, vector<4x384xf32>,
    %c0_22 = arith.constant 0 : index
    %c129 = arith.constant 129 : index
    %43 = vector.load %arg6[%c0_22, %c129] : memref<4x640xf32, #tpu.memory_space<vmem>>, vector<4x384xf32>
    %c40 = arith.constant 40 : index
    %c0_23 = arith.constant 0 : index
    %44 = vector.load %arg8[%c40, %c0_23] : memref<72x384xf32, #tpu.memory_space<vmem>>, vector<4x384xf32>
    tpu.vector_store %arg8[%c40, %c0_23], %43 {strides = array<i32>} : memref<72x384xf32, #tpu.memory_space<vmem>>, vector<4x384xf32>,
    %c0_24 = arith.constant 0 : index
    %c144 = arith.constant 144 : index
    %45 = vector.load %arg6[%c0_24, %c144] : memref<4x640xf32, #tpu.memory_space<vmem>>, vector<4x384xf32>
    %c48 = arith.constant 48 : index
    %c0_25 = arith.constant 0 : index
    %46 = vector.load %arg8[%c48, %c0_25] : memref<72x384xf32, #tpu.memory_space<vmem>>, vector<4x384xf32>
    tpu.vector_store %arg8[%c48, %c0_25], %45 {strides = array<i32>} : memref<72x384xf32, #tpu.memory_space<vmem>>, vector<4x384xf32>,
    %c0_26 = arith.constant 0 : index
    %c145 = arith.constant 145 : index
    %47 = vector.load %arg6[%c0_26, %c145] : memref<4x640xf32, #tpu.memory_space<vmem>>, vector<4x384xf32>
    %c56 = arith.constant 56 : index
    %c0_27 = arith.constant 0 : index
    %48 = vector.load %arg8[%c56, %c0_27] : memref<72x384xf32, #tpu.memory_space<vmem>>, vector<4x384xf32>
    tpu.vector_store %arg8[%c56, %c0_27], %47 {strides = array<i32>} : memref<72x384xf32, #tpu.memory_space<vmem>>, vector<4x384xf32>,
    %c0_28 = arith.constant 0 : index
    %c146 = arith.constant 146 : index
    %49 = vector.load %arg6[%c0_28, %c146] : memref<4x640xf32, #tpu.memory_space<vmem>>, vector<4x384xf32>
    %c64 = arith.constant 64 : index
    %c0_29 = arith.constant 0 : index
    %50 = vector.load %arg8[%c64, %c0_29] : memref<72x384xf32, #tpu.memory_space<vmem>>, vector<4x384xf32>
    tpu.vector_store %arg8[%c64, %c0_29], %49 {strides = array<i32>} : memref<72x384xf32, #tpu.memory_space<vmem>>, vector<4x384xf32>,
    %c0_30 = arith.constant 0 : index
    %c0_31 = arith.constant 0 : index
    %51 = vector.load %arg2[%c0_30, %c0_31] : memref<4x72xf32, #tpu.memory_space<vmem>>, vector<4x72xf32>
    %c0_32 = arith.constant 0 : index
    %c0_33 = arith.constant 0 : index
    %52 = vector.load %arg8[%c0_32, %c0_33] : memref<72x384xf32, #tpu.memory_space<vmem>>, vector<72x384xf32>
    %cst = arith.constant dense<0.000000e+00> : vector<4x384xf32>
    %53 = tpu.matmul %51, %52, %cst {dimension_numbers = #tpu.dot_dimension_numbers<[1], [0], [0], [1], [0, 0, 1, 1], [], []>} : vector<4x72xf32>, vector<72x384xf32>, vector<4x384xf32> -> vector<4x384xf32>
    %54 = vector.broadcast %4 : vector<4x1xf32> to vector<4x384xf32>
    %55 = arith.mulf %53, %54 : vector<4x384xf32>
    %56 = vector.broadcast %5 : vector<4x1xf32> to vector<4x384xf32>
    %57 = arith.addf %55, %56 : vector<4x384xf32>
    %cst_34 = arith.constant 0.000000e+00 : f32
    %58 = vector.broadcast %cst_34 : f32 to vector<4x384xf32>
    %59 = arith.maximumf %57, %58 : vector<4x384xf32>
    %cst_35 = arith.constant 0.000000e+00 : f32
    %60 = vector.shape_cast %29 : vector<1x384xi1> to vector<1x384xi1>
    %61 = vector.broadcast %60 : vector<1x384xi1> to vector<4x384xi1>
    %62 = vector.broadcast %cst_35 : f32 to vector<4x384xf32>
    %63 = arith.select %61, %59, %62 : vector<4x384xi1>, vector<4x384xf32>
    %c0_36 = arith.constant 0 : index
    %c128_37 = arith.constant 128 : index
    %64 = vector.load %arg7[%c0_36, %c128_37] : memref<4x640xf32, #tpu.memory_space<vmem>>, vector<4x384xf32>
    tpu.vector_store %arg7[%c0_36, %c128_37], %63 {strides = array<i32>} : memref<4x640xf32, #tpu.memory_space<vmem>>, vector<4x384xf32>,
    %c0_38 = arith.constant 0 : index
    %c110_39 = arith.constant 110 : index
    %65 = vector.load %arg7[%c0_38, %c110_39] : memref<4x640xf32, #tpu.memory_space<vmem>>, vector<4x384xf32>
    %c0_40 = arith.constant 0 : index
    %c0_41 = arith.constant 0 : index
    %66 = vector.load %arg8[%c0_40, %c0_41] : memref<72x384xf32, #tpu.memory_space<vmem>>, vector<4x384xf32>
    tpu.vector_store %arg8[%c0_40, %c0_41], %65 {strides = array<i32>} : memref<72x384xf32, #tpu.memory_space<vmem>>, vector<4x384xf32>,
    %c0_42 = arith.constant 0 : index
    %c111_43 = arith.constant 111 : index
    %67 = vector.load %arg7[%c0_42, %c111_43] : memref<4x640xf32, #tpu.memory_space<vmem>>, vector<4x384xf32>
    %c8_44 = arith.constant 8 : index
    %c0_45 = arith.constant 0 : index
    %68 = vector.load %arg8[%c8_44, %c0_45] : memref<72x384xf32, #tpu.memory_space<vmem>>, vector<4x384xf32>
    tpu.vector_store %arg8[%c8_44, %c0_45], %67 {strides = array<i32>} : memref<72x384xf32, #tpu.memory_space<vmem>>, vector<4x384xf32>,
    %c0_46 = arith.constant 0 : index
    %c112_47 = arith.constant 112 : index
    %69 = vector.load %arg7[%c0_46, %c112_47] : memref<4x640xf32, #tpu.memory_space<vmem>>, vector<4x384xf32>
    %c16_48 = arith.constant 16 : index
    %c0_49 = arith.constant 0 : index
    %70 = vector.load %arg8[%c16_48, %c0_49] : memref<72x384xf32, #tpu.memory_space<vmem>>, vector<4x384xf32>
    tpu.vector_store %arg8[%c16_48, %c0_49], %69 {strides = array<i32>} : memref<72x384xf32, #tpu.memory_space<vmem>>, vector<4x384xf32>,
    %c0_50 = arith.constant 0 : index
    %c127_51 = arith.constant 127 : index
    %71 = vector.load %arg7[%c0_50, %c127_51] : memref<4x640xf32, #tpu.memory_space<vmem>>, vector<4x384xf32>
    %c24_52 = arith.constant 24 : index
    %c0_53 = arith.constant 0 : index
    %72 = vector.load %arg8[%c24_52, %c0_53] : memref<72x384xf32, #tpu.memory_space<vmem>>, vector<4x384xf32>
    tpu.vector_store %arg8[%c24_52, %c0_53], %71 {strides = array<i32>} : memref<72x384xf32, #tpu.memory_space<vmem>>, vector<4x384xf32>,
    %c0_54 = arith.constant 0 : index
    %c128_55 = arith.constant 128 : index
    %73 = vector.load %arg7[%c0_54, %c128_55] : memref<4x640xf32, #tpu.memory_space<vmem>>, vector<4x384xf32>
    %c32_56 = arith.constant 32 : index
    %c0_57 = arith.constant 0 : index
    %74 = vector.load %arg8[%c32_56, %c0_57] : memref<72x384xf32, #tpu.memory_space<vmem>>, vector<4x384xf32>
    tpu.vector_store %arg8[%c32_56, %c0_57], %73 {strides = array<i32>} : memref<72x384xf32, #tpu.memory_space<vmem>>, vector<4x384xf32>,
    %c0_58 = arith.constant 0 : index
    %c129_59 = arith.constant 129 : index
    %75 = vector.load %arg7[%c0_58, %c129_59] : memref<4x640xf32, #tpu.memory_space<vmem>>, vector<4x384xf32>
    %c40_60 = arith.constant 40 : index
    %c0_61 = arith.constant 0 : index
    %76 = vector.load %arg8[%c40_60, %c0_61] : memref<72x384xf32, #tpu.memory_space<vmem>>, vector<4x384xf32>
    tpu.vector_store %arg8[%c40_60, %c0_61], %75 {strides = array<i32>} : memref<72x384xf32, #tpu.memory_space<vmem>>, vector<4x384xf32>,
    %c0_62 = arith.constant 0 : index
    %c144_63 = arith.constant 144 : index
    %77 = vector.load %arg7[%c0_62, %c144_63] : memref<4x640xf32, #tpu.memory_space<vmem>>, vector<4x384xf32>
    %c48_64 = arith.constant 48 : index
    %c0_65 = arith.constant 0 : index
    %78 = vector.load %arg8[%c48_64, %c0_65] : memref<72x384xf32, #tpu.memory_space<vmem>>, vector<4x384xf32>
    tpu.vector_store %arg8[%c48_64, %c0_65], %77 {strides = array<i32>} : memref<72x384xf32, #tpu.memory_space<vmem>>, vector<4x384xf32>,
    %c0_66 = arith.constant 0 : index
    %c145_67 = arith.constant 145 : index
    %79 = vector.load %arg7[%c0_66, %c145_67] : memref<4x640xf32, #tpu.memory_space<vmem>>, vector<4x384xf32>
    %c56_68 = arith.constant 56 : index
    %c0_69 = arith.constant 0 : index
    %80 = vector.load %arg8[%c56_68, %c0_69] : memref<72x384xf32, #tpu.memory_space<vmem>>, vector<4x384xf32>
    tpu.vector_store %arg8[%c56_68, %c0_69], %79 {strides = array<i32>} : memref<72x384xf32, #tpu.memory_space<vmem>>, vector<4x384xf32>,
    %c0_70 = arith.constant 0 : index
    %c146_71 = arith.constant 146 : index
    %81 = vector.load %arg7[%c0_70, %c146_71] : memref<4x640xf32, #tpu.memory_space<vmem>>, vector<4x384xf32>
    %c64_72 = arith.constant 64 : index
    %c0_73 = arith.constant 0 : index
    %82 = vector.load %arg8[%c64_72, %c0_73] : memref<72x384xf32, #tpu.memory_space<vmem>>, vector<4x384xf32>
    tpu.vector_store %arg8[%c64_72, %c0_73], %81 {strides = array<i32>} : memref<72x384xf32, #tpu.memory_space<vmem>>, vector<4x384xf32>,
    %c0_74 = arith.constant 0 : index
    %c0_75 = arith.constant 0 : index
    %83 = vector.load %arg3[%c0_74, %c0_75] : memref<4x72xf32, #tpu.memory_space<vmem>>, vector<4x72xf32>
    %c0_76 = arith.constant 0 : index
    %c0_77 = arith.constant 0 : index
    %84 = vector.load %arg8[%c0_76, %c0_77] : memref<72x384xf32, #tpu.memory_space<vmem>>, vector<72x384xf32>
    %cst_78 = arith.constant dense<0.000000e+00> : vector<4x384xf32>
    %85 = tpu.matmul %83, %84, %cst_78 {dimension_numbers = #tpu.dot_dimension_numbers<[1], [0], [0], [1], [0, 0, 1, 1], [], []>} : vector<4x72xf32>, vector<72x384xf32>, vector<4x384xf32> -> vector<4x384xf32>
    %86 = vector.broadcast %6 : vector<4x1xf32> to vector<4x384xf32>
    %87 = arith.mulf %85, %86 : vector<4x384xf32>
    %88 = vector.broadcast %7 : vector<4x1xf32> to vector<4x384xf32>
    %89 = arith.addf %87, %88 : vector<4x384xf32>
    %90 = arith.addf %89, %31 : vector<4x384xf32>
    %cst_79 = arith.constant 0.000000e+00 : f32
    %91 = vector.broadcast %cst_79 : f32 to vector<4x384xf32>
    %92 = arith.maximumf %90, %91 : vector<4x384xf32>
    %c0_80 = arith.constant 0 : index
    %c0_81 = arith.constant 0 : index
    %c0_82 = arith.constant 0 : index
    %93 = vector.load %arg5[%c0_80, %c0_81, %c0_82] : memref<1x4x384xf32, #tpu.memory_space<vmem>>, vector<1x4x384xf32>
    %94 = vector.shape_cast %93 : vector<1x4x384xf32> to vector<4x384xf32>
    %95 = vector.shape_cast %92 : vector<4x384xf32> to vector<1x4x384xf32>
    tpu.vector_store %arg5[%c0_80, %c0_81, %c0_82], %95 {strides = array<i32>} : memref<1x4x384xf32, #tpu.memory_space<vmem>>, vector<1x4x384xf32>,
    return
  }
  func.func @transform_0(%arg0: i32) -> (i32, i32, i32) {
    %c0_i32 = arith.constant 0 : i32
    %c0_i32_0 = arith.constant 0 : i32
    %c0_i32_1 = arith.constant 0 : i32
    return %arg0, %c0_i32, %c0_i32_0 : i32, i32, i32
  }
  func.func @transform_1(%arg0: i32) -> (i32, i32) {
    %c0_i32 = arith.constant 0 : i32
    %c0_i32_0 = arith.constant 0 : i32
    %c0_i32_1 = arith.constant 0 : i32
    return %c0_i32, %c0_i32_0 : i32, i32
  }
  func.func @transform_2(%arg0: i32) -> (i32, i32) {
    %c0_i32 = arith.constant 0 : i32
    %c0_i32_0 = arith.constant 0 : i32
    %c0_i32_1 = arith.constant 0 : i32
    return %c0_i32, %c0_i32_0 : i32, i32
  }
  func.func @transform_3(%arg0: i32) -> (i32, i32) {
    %c0_i32 = arith.constant 0 : i32
    %c0_i32_0 = arith.constant 0 : i32
    %c0_i32_1 = arith.constant 0 : i32
    return %c0_i32, %c0_i32_0 : i32, i32
  }
  func.func @transform_4(%arg0: i32) -> (i32, i32, i32) {
    %c0_i32 = arith.constant 0 : i32
    %c0_i32_0 = arith.constant 0 : i32
    %c0_i32_1 = arith.constant 0 : i32
    return %arg0, %c0_i32, %c0_i32_0 : i32, i32, i32
  }
}

</mosaic_0001>

<bundles_post_ra>
// kernel: basic_block_forward.1
= control target key start
LH: loop header
LB: loop body
LE: loop exit
PB: predicated region body
PF: predicated region fallthrough
CT: control target
= control target key end

     0   :  { %s1379_s15 = smov 0   ;;  %s1622_s0 = inlined_call_operand.vmem [shape: f32[2,4,384], index: 0, kind: input, shape index: {}]   ;;  %s1623_s1 = inlined_call_operand.vmem [shape: f32[4,72], index: 1, kind: input, shape index: {}]   ;;  %s1624_s2 = inlined_call_operand.vmem [shape: f32[4,72], index: 2, kind: input, shape index: {}]   ;;  %s1625_s3 = inlined_call_operand.vmem [shape: f32[4,4], index: 3, kind: input, shape index: {}]   ;;  %s1626_s4 = inlined_call_operand.vmem [shape: f32[2,4,384], index: 4, kind: output, shape index: {}]  }
   0x1 LB: > { %s1155_s16 = sadd.s32 4294967295, %s1336_s15   ;;  %p1159_p0 = scmp.ge.s32.totalorder %s1336_s15, 1  ;;  %s1336_s15 = sphi %s1379_s15, %s14_s15  }
   0x2   : > { %p162_p1 = scmp.lt.s32.totalorder %s1336_s15, 3 }
   0x4   : > { %p163_p2 = pnand %p1159_p0, %p162_p1 }
   0x5   : > { %p188_p3 = scmp.lt.s32.totalorder (!%p163_p2), %s1155_s16, 1  ;;  %p1162_p4 = scmp.ne.s32.totalorder (!%p163_p2), %s1155_s16, 0 }
   0x6   : > { %166 = sbr.rel (%p163_p2) target bundleno = 865 (0x361), region = 36 }
   0xd   : > { %s189_s17 = scalar_select %p188_p3, %s1155_s16, 1 }
   0xe   : > { %201 = sbr.rel (%p1162_p4) target bundleno = 32 (0x20), region = 40  ;;  %v1338_v0 = vmov (!%p1162_p4), 0.0  }
   0xf   : > { %s1287_s18 = smul.u32 12, %s189_s17  ;;  %202 = vst [vmem:[#allocation2] sm:$0xff] (!%p1162_p4), %v1338_v0  ;;  %203 = vst [vmem:[#allocation2 + $0x8] sm:$0xff] (!%p1162_p4), %v1338_v0 }
  0x10   : > { %204 = vst [vmem:[#allocation2 + $0x10] sm:$0xf] (!%p1162_p4), %v1338_v0  ;;  %205 = vst [vmem:[#allocation3] sm:$0xff] (!%p1162_p4), %v1338_v0 }
  0x11   : > { %s1390_s21 = scalar_lea.vmem %s1622_s0, %s1287_s18  ;;  %s1395_s24 = scalar_lea.vmem %s1626_s4, %s1287_s18  ;;  %206 = vst [vmem:[#allocation3 + $0x8] sm:$0xff] (!%p1162_p4), %v1338_v0  ;;  %207 = vst [vmem:[#allocation3 + $0x10] sm:$0xf] (!%p1162_p4), %v1338_v0 }
  0x12   : > { %208 = vst [vmem:[#allocation4] sm:$0xff] (!%p1162_p4), %v1338_v0  ;;  %209 = vst [vmem:[#allocation4 + $0x8] sm:$0xff] (!%p1162_p4), %v1338_v0 }
  0x13   : > { %210 = vst [vmem:[#allocation4 + $0x10] sm:$0xff] (!%p1162_p4), %v1338_v0  ;;  %211 = vst [vmem:[#allocation4 + $0x18] sm:$0xff] (!%p1162_p4), %v1338_v0 }
  0x14   : > { %212 = vst [vmem:[#allocation4 + $0x20] sm:$0xff] (!%p1162_p4), %v1338_v0  ;;  %213 = vst [vmem:[#allocation4 + $0x28] sm:$0xff] (!%p1162_p4), %v1338_v0 }
  0x15   : > { %214 = vst [vmem:[#allocation4 + $0x30] sm:$0xff] %v1338_v0  ;;  %215 = vst [vmem:[#allocation4 + $0x38] sm:$0xff] %v1338_v0 }
  0x16   : > { %216 = vst [vmem:[#allocation4 + $0x40] sm:$0xff] %v1338_v0  ;;  %217 = vst [vmem:[#allocation4 + $0x48] sm:$0xff] %v1338_v0 }
  0x17   : > { %218 = vst [vmem:[#allocation4 + $0x50] sm:$0xff] %v1338_v0  ;;  %219 = vst [vmem:[#allocation4 + $0x58] sm:$0xff] %v1338_v0 }
  0x18   : > { %220 = vst [vmem:[#allocation4 + $0x60] sm:$0xff] %v1338_v0  ;;  %221 = vst [vmem:[#allocation4 + $0x68] sm:$0xff] %v1338_v0 }
  0x19   : > { %222 = vst [vmem:[#allocation4 + $0x70] sm:$0xff] %v1338_v0  ;;  %223 = vst [vmem:[#allocation4 + $0x78] sm:$0xff] %v1338_v0 }
  0x1a   : > { %224 = vst [vmem:[#allocation4 + $0x80] sm:$0xff] %v1338_v0  ;;  %225 = vst [vmem:[#allocation4 + $0x88] sm:$0xff] %v1338_v0 }
  0x1b   : > { %226 = vst [vmem:[#allocation4 + $0x90] sm:$0xff] %v1338_v0  ;;  %227 = vst [vmem:[#allocation4 + $0x98] sm:$0xff] %v1338_v0 }
  0x1c   : > { %228 = vst [vmem:[#allocation4 + $0xa0] sm:$0xff] %v1338_v0  ;;  %229 = vst [vmem:[#allocation4 + $0xa8] sm:$0xff] %v1338_v0 }
  0x1d   : > { %230 = vst [vmem:[#allocation4 + $0xb0] sm:$0xff] %v1338_v0  ;;  %231 = vst [vmem:[#allocation4 + $0xb8] sm:$0xff] %v1338_v0 }
  0x1e   : > { %232 = vst [vmem:[#allocation4 + $0xc0] sm:$0xff] %v1338_v0  ;;  %233 = vst [vmem:[#allocation4 + $0xc8] sm:$0xff] %v1338_v0 }
  0x1f   : > { %234 = vst [vmem:[#allocation4 + $0xd0] sm:$0xff] %v1338_v0 }
  0x20 PF: > { %v1398_v1 = vld [vmem:[%s1390_s21] sm:$0xff]  ;;  %v1401_v2 = vld [vmem:[%s1390_s21 + $0x8] sm:$0xf]  ;;  %s1339_s25 = smov 17   ;;  %s1340_s26 = smov 18   ;;  %v1343_v8 = vmov 0.0|0.0  }
  0x21   : > { %299 = vst [vmem:[#allocation2 + $0x4] sm:$0xff] %v1398_v1  ;;  %300 = vst [vmem:[#allocation2 + $0xc] sm:$0xf] %v1401_v2  ;;  %v1407_v3 = vcombine.high %v1398_v1, %v1398_v1  ;;  %s1341_s27 = smov 16   ;;  %s1342_s28 = smov 1   ;;  %1247 = vmatprep.subr.bf16.mxu1 %v1343_v8  ;;  %v1347_v12 = vmov 0.0  }
  0x22   : > { %402 = vst [vmem:[#allocation4 + $0x60] sm:$0xf] %v1398_v1  ;;  %s1344_s29 = smov 127   ;;  %s1345_s30 = smov 112   ;;  %597 = vmatprep.mubr.f32.mxu0 %v1347_v12  ;;  %vm1349_vm0 = vmmov 0   ;;  %v1350_v13 = vmov 0  }
  0x23   : > { %403 = vst [vmem:[#allocation4 + $0x68] sm:$0xf] %v1407_v3  ;;  %s1346_s5 = smov 111   ;;  %s1348_s6 = smov 110   ;;  %1207 = vmatprep.mubr.msk.f32.mxu1 %vm1349_vm0, %v1347_v12  ;;  %1318 = vset.pattern.permute.xlu0 %v1350_v13  ;;  %v1351_v14 = vmov 1   ;;  %vm339_vm1 = vcmask 138240  }
  0x24   : > { %1319 = vset.pattern.permute.xlu1 %v1351_v14  ;;  %v1458_v15 = vld [vmem:[%s1625_s3] sm:$0xf]  ;;  %vm315_vm2 = vcmask 146432   ;;  %vm363_vm3 = vcmask 130048   ;;  %vm387_vm4 = vcmask 7168   ;;  %vm419_vm5 = vcmask 1039360  }
  0x25   : > { %vm443_vm6 = vcmask 916480   ;;  %vm467_vm7 = vcmask 908288   ;;  %vm1628_vm8 = vcmask 900096   ;;  %vm1627_vm9 = vcmask 588800  }
  0x28   : > { %v326_v4 = vld [vmem:[#allocation2 + $0x8] sm:$0xff]  ;;  %v325_v5 = vld [vmem:[#allocation2] sm:$0xff] }
  0x29   : > { %335 = vrot.lane.b32.xlu1 %v326_v4, %s1339_s25  ;;  %311 = vrot.lane.b32.xlu0 %v326_v4, %s1340_s26  ;;  %v329_v6 = vcombine.high %v325_v5, %v325_v5  ;;  %v330_v7 = vcombine.high %v326_v4, %v326_v4  ;;  %v406_v9 = vld [vmem:[#allocation2 + $0xc] sm:$0xff] }
  0x2a   : > { %v398_v10 = vld [vmem:[#allocation2 + $0xc] sm:$0xf]  ;;  %v410_v11 = vcombine.high %v406_v9, %v406_v9  ;;  %v515_v62 = vld [vmem:[#allocation4 + $0x68] sm:$0xff] }
  0x2b   : > { %404 = vst [vmem:[#allocation4 + $0x70] sm:$0xf] %v398_v10 }
  0x2d   : > { %331 = vrot.lane.b32.xlu1 %v325_v5, %s1339_s25  ;;  %307 = vrot.lane.b32.xlu0 %v325_v5, %s1340_s26 }
  0x31   : > { %333 = vrot.lane.b32.xlu1 %v329_v6, %s1339_s25  ;;  %309 = vrot.lane.b32.xlu0 %v329_v6, %s1340_s26 }
  0x35   : > { %359 = vrot.lane.b32.xlu1 %v326_v4, %s1341_s27  ;;  %357 = vrot.lane.b32.xlu0 %v329_v6, %s1341_s27 }
  0x39   : > { %383 = vrot.lane.b32.xlu1 %v326_v4, %s1342_s28  ;;  %381 = vrot.lane.b32.xlu0 %v329_v6, %s1342_s28 }
  0x3d   : > { %379 = vrot.lane.b32.xlu1 %v325_v5, %s1342_s28  ;;  %355 = vrot.lane.b32.xlu0 %v325_v5, %s1341_s27 }
  0x41   : > { %337 = vrot.lane.b32.xlu1 %v330_v7, %s1339_s25  ;;  %313 = vrot.lane.b32.xlu0 %v330_v7, %s1340_s26 }
  0x45   : > { %415 = vrot.lane.b32.xlu1 %v406_v9, %s1344_s29  ;;  %413 = vrot.lane.b32.xlu0 %v1407_v3, %s1344_s29 }
  0x49   : > { %361 = vrot.lane.b32.xlu1 %v330_v7, %s1341_s27  ;;  %411 = vrot.lane.b32.xlu0 %v1398_v1, %s1344_s29 }
  0x4d   : > { %437 = vrot.lane.b32.xlu1 %v1407_v3, %s1345_s30  ;;  %385 = vrot.lane.b32.xlu0 %v330_v7, %s1342_s28  ;;  %v514_v7 = vld [vmem:[#allocation4 + $0x60] sm:$0xff] }
  0x51   : > { %461 = vrot.lane.b32.xlu1 %v1407_v3, %s1346_s5  ;;  %439 = vrot.lane.b32.xlu0 %v406_v9, %s1345_s30 }
  0x55   : > { %435 = vrot.lane.b32.xlu1 %v1398_v1, %s1345_s30  ;;  %463 = vrot.lane.b32.xlu0 %v406_v9, %s1346_s5 }
  0x59   : > { %417 = vrot.lane.b32.xlu1 %v410_v11, %s1344_s29  ;;  %459 = vrot.lane.b32.xlu0 %v1398_v1, %s1346_s5 }
  0x5d   : > { %465 = vrot.lane.b32.xlu1 %v410_v11, %s1346_s5  ;;  %441 = vrot.lane.b32.xlu0 %v410_v11, %s1345_s30 }
  0x61   : > { %487 = vrot.lane.b32.xlu1 %v406_v9, %s1348_s6  ;;  %485 = vrot.lane.b32.xlu0 %v1407_v3, %s1348_s6 }
  0x65   : > { %489 = vrot.lane.b32.xlu1 %v410_v11, %s1348_s6  ;;  %483 = vrot.lane.b32.xlu0 %v1398_v1, %s1348_s6 }
  0x69   : > { %676 = vperm.xlu0 %1318, %v1458_v15   ;;  %683 = vperm.xlu1 %1319, %v1458_v15  }
  0x9b   : > { %v336_v16 = vpop.permute.xlu1 %335  ;;  %v312_v17 = vpop.permute.xlu0 %311 }
  0x9f   : > { %v332_v18 = vpop.permute.xlu1 %331  ;;  %v308_v19 = vpop.permute.xlu0 %307 }
  0xa3   : > { %v334_v20 = vpop.permute.xlu1 %333  ;;  %v310_v21 = vpop.permute.xlu0 %309 }
  0xa4   : > { %v340_v22 = vsel %vm339_vm1, %v332_v18, %v334_v20  ;;  %v341_v23 = vsel %vm339_vm1, %v334_v20, %v336_v16  ;;  %v316_v24 = vsel %vm315_vm2, %v308_v19, %v310_v21  ;;  %v317_v25 = vsel %vm315_vm2, %v310_v21, %v312_v17 }
  0xa5   : > { %346 = vst [vmem:[#allocation4 + $0x18] sm:$0xf] %v340_v22  ;;  %347 = vst [vmem:[#allocation4 + $0x20] sm:$0xf] %v341_v23 }
  0xa6   : > { %322 = vst [vmem:[#allocation4] sm:$0xf] %v316_v24  ;;  %323 = vst [vmem:[#allocation4 + $0x8] sm:$0xf] %v317_v25 }
  0xa7   : > { %v360_v26 = vpop.permute.xlu1 %359  ;;  %v358_v27 = vpop.permute.xlu0 %357 }
  0xa8   : > { %v365_v28 = vsel %vm363_vm3, %v358_v27, %v360_v26 }
  0xa9   : > { %371 = vst [vmem:[#allocation4 + $0x38] sm:$0xf] %v365_v28 }
  0xab   : > { %v384_v29 = vpop.permute.xlu1 %383  ;;  %v382_v30 = vpop.permute.xlu0 %381 }
  0xac   : > { %v389_v31 = vsel %vm387_vm4, %v382_v30, %v384_v29  ;;  %v506_v33 = vld [vmem:[#allocation4 + $0x20] sm:$0xff]  ;;  %v505_v36 = vld [vmem:[#allocation4 + $0x18] sm:$0xff] }
  0xad   : > { %v503_v32 = vld [vmem:[#allocation4 + $0x8] sm:$0xff]  ;;  %v502_v34 = vld [vmem:[#allocation4] sm:$0xff]  ;;  %395 = vst [vmem:[#allocation4 + $0x50] sm:$0xf] %v389_v31 }
  0xae   : > { %v1231_v35 = vpack.c.bf16 %v506_v33, %v503_v32  ;;  %v1233_v37 = vpack.c.bf16 %v505_v36, %v502_v34  ;;  %v516_v34 = vld [vmem:[#allocation4 + $0x70] sm:$0xff] }
  0xaf   : > { %v380_v38 = vpop.permute.xlu1 %379  ;;  %v356_v39 = vpop.permute.xlu0 %355 }
  0xb0   : > { %1232 = vmatprep.subr.bf16.mxu0 %v1231_v35  ;;  %v388_v40 = vsel %vm387_vm4, %v380_v38, %v382_v30  ;;  %v364_v41 = vsel %vm363_vm3, %v356_v39, %v358_v27  ;;  %v509_v46 = vld [vmem:[#allocation4 + $0x38] sm:$0xff] }
  0xb1   : > { %1234 = vmatpush1.bf16.msra.mxu0 %v1233_v37  ;;  %394 = vst [vmem:[#allocation4 + $0x48] sm:$0xf] %v388_v40  ;;  %370 = vst [vmem:[#allocation4 + $0x30] sm:$0xf] %v364_v41 }
  0xb3   : > { %v338_v42 = vpop.permute.xlu1 %337  ;;  %v314_v43 = vpop.permute.xlu0 %313 }
  0xb4   : > { %v342_v44 = vsel %vm339_vm1, %v336_v16, %v338_v42  ;;  %v318_v45 = vsel %vm315_vm2, %v312_v17, %v314_v43  ;;  %v512_v47 = vld [vmem:[#allocation4 + $0x50] sm:$0xff] }
  0xb5   : > { %348 = vst [vmem:[#allocation4 + $0x28] sm:$0xf] %v342_v44  ;;  %324 = vst [vmem:[#allocation4 + $0x10] sm:$0xf] %v318_v45  ;;  %v1235_v48 = vpack.c.bf16 %v512_v47, %v509_v46 }
  0xb7   : > { %v416_v49 = vpop.permute.xlu1 %415  ;;  %1236 = vmatprep.subr.bf16.mxu0 %v1235_v48  ;;  %v414_v50 = vpop.permute.xlu0 %413 }
  0xb8   : > { %v421_v51 = vsel %vm419_vm5, %v414_v50, %v416_v49  ;;  %v508_v52 = vld [vmem:[#allocation4 + $0x30] sm:$0xff]  ;;  %v511_v53 = vld [vmem:[#allocation4 + $0x48] sm:$0xff] }
  0xb9   : > { %427 = vst [vmem:[#allocation4 + $0x80] sm:$0xf] %v421_v51  ;;  %v1237_v54 = vpack.c.bf16 %v511_v53, %v508_v52  ;;  %v501_v51 = vld [vmem:[%s1623_s1] sm:$0xf] }
  0xbb   : > { %v362_v55 = vpop.permute.xlu1 %361  ;;  %1238 = vmatpush1.bf16.msra.mxu0 %v1237_v54  ;;  %v412_v56 = vpop.permute.xlu0 %411  ;;  %v236_v54 = vlaneseq }
  0xbc   : > { %v366_v57 = vsel %vm363_vm3, %v360_v26, %v362_v55  ;;  %v420_v58 = vsel %vm419_vm5, %v412_v56, %v414_v50  ;;  %v504_v59 = vld [vmem:[#allocation4 + $0x10] sm:$0xff]  ;;  %v507_v60 = vld [vmem:[#allocation4 + $0x28] sm:$0xff] }
  0xbd   : > { %372 = vst [vmem:[#allocation4 + $0x40] sm:$0xf] %v366_v57  ;;  %426 = vst [vmem:[#allocation4 + $0x78] sm:$0xf] %v420_v58  ;;  %v1248_v61 = vpack.c.bf16 %v507_v60, %v504_v59  ;;  %v237_v55 = vand.u32 127, %v236_v54 }
  0xbf   : > { %v438_v63 = vpop.permute.xlu1 %437  ;;  %1249 = vmatpush3.bf16.msra.mxu1 %v1248_v61  ;;  %v386_v0 = vpop.permute.xlu0 %385  ;;  %v239_v56 = vadd.s32 256, %v237_v55  ;;  %v238_v57 = vadd.s32 128, %v237_v55  ;;  %v1502_v60 = vmul.u32.u64.low 4042322161, %v237_v55  ;;  %v1503_v61 = vmul.u32.u64.high 4042322161, %v237_v55, %v1502_v60 }
  0xc0   : > { %v390_v4 = vsel %vm387_vm4, %v384_v29, %v386_v0  ;;  %v518_v5 = vld [vmem:[#allocation4 + $0x80] sm:$0xff]  ;;  %1250 = vmatprep.subr.bf16.mxu1 %v1343_v8 }
  0xc1   : > { %396 = vst [vmem:[#allocation4 + $0x58] sm:$0xf] %v390_v4  ;;  %v1239_v6 = vpack.c.bf16 %v518_v5, %v515_v62  ;;  %v1499_v58 = vmul.u32.u64.low 4042322161, %v239_v56  ;;  %v1500_v59 = vmul.u32.u64.high 4042322161, %v239_v56, %v1499_v58  ;;  %v246_v4 = vshrl.u32 %v1503_v61, 4 }
  0xc3   : > { %v462_v9 = vpop.permute.xlu1 %461  ;;  %1240 = vmatprep.subr.bf16.mxu0 %v1239_v6  ;;  %v440_v10 = vpop.permute.xlu0 %439  ;;  %v268_v0 = vshrl.u32 %v1500_v59, 4 }
  0xc4   : > { %v445_v11 = vsel %vm443_vm6, %v438_v63, %v440_v10  ;;  %v517_v13 = vld [vmem:[#allocation4 + $0x78] sm:$0xff]  ;;  %v510_v20 = vld [vmem:[#allocation4 + $0x40] sm:$0xff] }
  0xc5   : > { %451 = vst [vmem:[#allocation4 + $0x98] sm:$0xf] %v445_v11  ;;  %v1241_v14 = vpack.c.bf16 %v517_v13, %v514_v7  ;;  %v269_v6 = vmul.u32 17, %v268_v0  ;;  %v247_v7 = vmul.u32 17, %v246_v4 }
  0xc7   : > { %v436_v16 = vpop.permute.xlu1 %435  ;;  %1242 = vmatpush1.bf16.msra.mxu0 %v1241_v14  ;;  %v464_v17 = vpop.permute.xlu0 %463  ;;  %v248_v11 = vsub.s32 %v237_v55, %v247_v7 }
  0xc8   : > { %v444_v18 = vsel %vm443_vm6, %v436_v16, %v438_v63  ;;  %v469_v19 = vsel %vm467_vm7, %v462_v9, %v464_v17  ;;  %v513_v21 = vld [vmem:[#allocation4 + $0x58] sm:$0xff]  ;;  %v1505_v62 = vmul.u32.u64.low 4042322161, %v238_v57  ;;  %v1506_v63 = vmul.u32.u64.high 4042322161, %v238_v57, %v1505_v62 }
  0xc9   : > { %450 = vst [vmem:[#allocation4 + $0x90] sm:$0xf] %v444_v18  ;;  %475 = vst [vmem:[#allocation4 + $0xb0] sm:$0xf] %v469_v19  ;;  %v1251_v22 = vpack.c.bf16 %v513_v21, %v510_v20  ;;  %vm273_vm12 = vcmp.ne.s32.totalorder %v248_v11, 0  ;;  %vm276_vm13 = vcmp.lt.s32.totalorder %v248_v11, 0 }
  0xca   : > { %v257_v5 = vshrl.u32 %v1506_v63, 4 }
  0xcb   : > { %v418_v23 = vpop.permute.xlu1 %417  ;;  %1252 = vmatpush3.bf16.msra.mxu1 %v1251_v22  ;;  %v460_v24 = vpop.permute.xlu0 %459 }
  0xcc   : > { %v422_v25 = vsel %vm419_vm5, %v416_v49, %v418_v23  ;;  %v468_v26 = vsel %vm467_vm7, %v460_v24, %v462_v9  ;;  %1253 = vmatprep.subr.bf16.mxu1 %v1343_v8  ;;  %v521_v31 = vld [vmem:[#allocation4 + $0x98] sm:$0xff]  ;;  %v258_v9 = vmul.u32 17, %v257_v5 }
  0xcd   : > { %428 = vst [vmem:[#allocation4 + $0x88] sm:$0xf] %v422_v25  ;;  %474 = vst [vmem:[#allocation4 + $0xa8] sm:$0xf] %v468_v26 }
  0xce   : > { %v259_v13 = vsub.s32 %v238_v57, %v258_v9 }
  0xcf   : > { %v466_v27 = vpop.permute.xlu1 %465  ;;  %v442_v28 = vpop.permute.xlu0 %441 }
  0xd0   : > { %v470_v29 = vsel %vm467_vm7, %v464_v17, %v466_v27  ;;  %v446_v30 = vsel %vm443_vm6, %v440_v10, %v442_v28  ;;  %v524_v32 = vld [vmem:[#allocation4 + $0xb0] sm:$0xff]  ;;  %v270_v10 = vsub.s32 %v239_v56, %v269_v6  ;;  %vm274_vm15 = vcmp.ne.s32.totalorder %v259_v13, 0 }
  0xd1   : > { %476 = vst [vmem:[#allocation4 + $0xb8] sm:$0xf] %v470_v29  ;;  %452 = vst [vmem:[#allocation4 + $0xa0] sm:$0xf] %v446_v30  ;;  %v1243_v33 = vpack.c.bf16 %v524_v32, %v521_v31  ;;  %v520_v38 = vld [vmem:[#allocation4 + $0x90] sm:$0xff]  ;;  %v282_v17 = vadd.s32 17, %v248_v11 }
  0xd2   : > { %vm275_vm10 = vcmp.ne.s32.totalorder %v270_v10, 0  ;;  %vm278_vm11 = vcmp.lt.s32.totalorder %v270_v10, 0  ;;  %v284_v14 = vadd.s32 17, %v270_v10  ;;  %v283_v20 = vadd.s32 17, %v259_v13 }
  0xd3   : > { %v488_v35 = vpop.permute.xlu1 %487  ;;  %1244 = vmatprep.subr.bf16.mxu0 %v1243_v33  ;;  %v486_v36 = vpop.permute.xlu0 %485  ;;  %vm1511_vm14 = vmand %vm278_vm11, %vm275_vm10  ;;  %vm293_vm10 = vcmp.lt.s32.totalorder %v239_v56, 272 }
  0xd4   : > { %v493_v37 = vsel %vm1628_vm8, %v486_v36, %v488_v35  ;;  %v523_v39 = vld [vmem:[#allocation4 + $0xa8] sm:$0xff]  ;;  %v287_v21 = vsel %vm1511_vm14, %v284_v14, %v270_v10 }
  0xd5   : > { %v519_v40 = vld [vmem:[#allocation4 + $0x88] sm:$0xff]  ;;  %499 = vst [vmem:[#allocation4 + $0xc8] sm:$0xf] %v493_v37  ;;  %v1245_v41 = vpack.c.bf16 %v523_v39, %v520_v38  ;;  %vm290_vm11 = vcmp.ne.s32.totalorder %v287_v21, 16 }
  0xd6   : > { %v1254_v42 = vpack.c.bf16 %v519_v40, %v516_v34 }
  0xd7   : > { %v490_v43 = vpop.permute.xlu1 %489  ;;  %1246 = vmatpush1.bf16.msra.mxu0 %v1245_v41  ;;  %v484_v44 = vpop.permute.xlu0 %483 }
  0xd8   : > { %1255 = vmatpush3.bf16.msra.mxu1 %v1254_v42  ;;  %v494_v45 = vsel %vm1628_vm8, %v488_v35, %v490_v43  ;;  %v492_v46 = vsel %vm1628_vm8, %v484_v44, %v486_v36  ;;  %v522_v47 = vld [vmem:[#allocation4 + $0xa0] sm:$0xff]  ;;  %v525_v48 = vld [vmem:[#allocation4 + $0xb8] sm:$0xff] }
  0xd9   : > { %1256 = vmatprep.subr.bf16.mxu1 %v1343_v8  ;;  %500 = vst [vmem:[#allocation4 + $0xd0] sm:$0xf] %v494_v45  ;;  %498 = vst [vmem:[#allocation4 + $0xc0] sm:$0xf] %v492_v46  ;;  %v1257_v49 = vpack.c.bf16 %v525_v48, %v522_v47 }
  0xdc   : > { %1258 = vmatpush3.bf16.msra.mxu1 %v1257_v49  ;;  %v527_v50 = vld [vmem:[#allocation4 + $0xc8] sm:$0xff] }
  0xdd   : > { %1205 = vmatprep.subr.mxu1 %v1347_v12  ;;  %549 = vmatprep.subr.mxu0 %v527_v50 }
  0xe0   : > { %v526_v52 = vld [vmem:[#allocation4 + $0xc0] sm:$0xff]  ;;  %v528_v53 = vld [vmem:[#allocation4 + $0xd0] sm:$0xff] }
  0xe1   : > { %550 = vmatpush1.msra.mxu0 %v526_v52  ;;  %1206 = vmatpush3.msra.mxu1 %v528_v53  ;;  %v1353_v52 = vmov 3  }
  0xe2   : > { %1163 = vmatmul.mubr.msk.f32.vlgmr.msra.gmra.mrb[0].mxu0 %vm1627_vm9, %v501_v51  ;;  %1208 = vmatmul.mubr.msk.f32.vlgmr.msra.gmra.mrb[0].mxu1 %vm1627_vm9, %v501_v51  ;;  %vm1515_vm9 = vmand %vm276_vm13, %vm273_vm12  ;;  %v1352_v51 = vmov 2  }
  0xe3   : > { %1275 = vmatprep.subr.bf16.mxu1 %v1343_v8  ;;  %994 = vmatprep.mubr.f32.mxu0 %v1347_v12  ;;  %v285_v29 = vsel %vm1515_vm9, %v282_v17, %v248_v11  ;;  %vm296_vm13 = vmand %vm290_vm11, %vm293_vm10 }
  0xe4   : > { %1228 = vmatprep.mubr.msk.f32.mxu1 %vm1349_vm0, %v1347_v12  ;;  %vm277_vm0 = vcmp.lt.s32.totalorder %v259_v13, 0  ;;  %vm288_vm12 = vcmp.ne.s32.totalorder %v285_v29, 16  ;;  %1320 = vset.pattern.permute.xlu1 %v1352_v51 }
  0xe5   : > { %vm1521_vm8 = vmand %vm277_vm0, %vm274_vm15  ;;  %1321 = vset.pattern.permute.xlu0 %v1353_v52 }
  0xe6   : > { %v286_v32 = vsel %vm1521_vm8, %v283_v20, %v259_v13 }
  0xe7   : > { %vm289_vm14 = vcmp.ne.s32.totalorder %v286_v32, 16 }
  0xe8   : > { %v677_v18 = vpop.permute.xlu0 %676  ;;  %v684_v23 = vpop.permute.xlu1 %683 }
 0x1b5   : > { %v599_v24 = vpop.f32.mrb[0].mxu0  ;;  %v670_v25 = vpop.f32.mrb[0].mxu1 }
 0x1b6   : > { %v679_v26 = vmul.f32 %v677_v18, %v599_v24  ;;  %v681_v27 = vmul.f32 %v677_v18, %v670_v25  ;;  %v601_v28 = vpop.f32.mrb[1].mxu0  ;;  %v1209_v30 = vpop.f32.mrb[1].mxu1 }
 0x1b7   : > { %v680_v31 = vmul.f32 %v677_v18, %v601_v28 }
 0x1b8   : > { %v686_v33 = vadd.f32 %v684_v23, %v679_v26  ;;  %v688_v34 = vadd.f32 %v684_v23, %v681_v27 }
 0x1b9   : > { %v687_v35 = vadd.f32 %v684_v23, %v680_v31 }
 0x1ba   : > { %v689_v36 = vmax.f32 %v686_v33, 0.0  ;;  %v691_v37 = vmax.f32 %v688_v34, 0.0 }
 0x1bb   : > { %v690_v38 = vmax.f32 %v687_v35, 0.0 }
 0x1bc   : > { %v698_v39 = vsel %vm288_vm12, %v689_v36, 0.0  ;;  %v700_v40 = vsel %vm296_vm13, %v691_v37, 0.0 }
 0x1bd   : > { %v699_v41 = vsel %vm289_vm14, %v690_v38, 0.0  ;;  %706 = vst [vmem:[#allocation3 + $0xc] sm:$0xf] %v700_v40 }
 0x1be   : > { %v703_v42 = vcombine.low %v698_v39, %v699_v41  ;;  %v1329_v43 = vcombine.low %v699_v41, %v699_v41 }
 0x1c0   : > { %705 = vst [vmem:[#allocation3 + $0x4] sm:$0xff] %v703_v42  ;;  %804 = vst [vmem:[#allocation4 + $0x60] sm:$0xf] %v703_v42 }
 0x1c1   : > { %805 = vst [vmem:[#allocation4 + $0x68] sm:$0xf] %v1329_v43 }
 0x1c4   : > { %v800_v44 = vld [vmem:[#allocation3 + $0xc] sm:$0xf] }
 0x1c5   : > { %v808_v45 = vld [vmem:[#allocation3 + $0xc] sm:$0xff]  ;;  %806 = vst [vmem:[#allocation4 + $0x70] sm:$0xf] %v800_v44 }
 0x1c6   : > { %817 = vrot.lane.b32.xlu0 %v808_v45, %s1344_s29  ;;  %v812_v47 = vcombine.high %v808_v45, %v808_v45 }
 0x1c7   : > { %v707_v46 = vld [vmem:[#allocation3] sm:$0xff]  ;;  %v708_v48 = vld [vmem:[#allocation3 + $0x8] sm:$0xff] }
 0x1c8   : > { %713 = vrot.lane.b32.xlu1 %v707_v46, %s1340_s26  ;;  %v711_v49 = vcombine.high %v707_v46, %v707_v46  ;;  %v712_v50 = vcombine.high %v708_v48, %v708_v48 }
 0x1ca   : > { %840 = vrot.lane.b32.xlu0 %v808_v45, %s1345_s30 }
 0x1cc   : > { %759 = vrot.lane.b32.xlu1 %v707_v46, %s1341_s27 }
 0x1ce   : > { %863 = vrot.lane.b32.xlu0 %v808_v45, %s1346_s5 }
 0x1d0   : > { %813 = vrot.lane.b32.xlu1 %v703_v42, %s1344_s29 }
 0x1d2   : > { %819 = vrot.lane.b32.xlu0 %v812_v47, %s1344_s29 }
 0x1d4   : > { %836 = vrot.lane.b32.xlu1 %v703_v42, %s1345_s30 }
 0x1d6   : > { %717 = vrot.lane.b32.xlu0 %v708_v48, %s1340_s26 }
 0x1d8   : > { %715 = vrot.lane.b32.xlu1 %v711_v49, %s1340_s26 }
 0x1da   : > { %740 = vrot.lane.b32.xlu0 %v708_v48, %s1339_s25 }
 0x1dc   : > { %738 = vrot.lane.b32.xlu1 %v711_v49, %s1339_s25 }
 0x1de   : > { %736 = vrot.lane.b32.xlu0 %v707_v46, %s1339_s25 }
 0x1e0   : > { %719 = vrot.lane.b32.xlu1 %v712_v50, %s1340_s26 }
 0x1e2   : > { %763 = vrot.lane.b32.xlu0 %v708_v48, %s1341_s27 }
 0x1e4   : > { %761 = vrot.lane.b32.xlu1 %v711_v49, %s1341_s27 }
 0x1e6   : > { %786 = vrot.lane.b32.xlu0 %v708_v48, %s1342_s28 }
 0x1e8   : > { %784 = vrot.lane.b32.xlu1 %v711_v49, %s1342_s28 }
 0x1ea   : > { %782 = vrot.lane.b32.xlu0 %v707_v46, %s1342_s28 }
 0x1ec   : > { %765 = vrot.lane.b32.xlu1 %v712_v50, %s1341_s27 }
 0x1ee   : > { %742 = vrot.lane.b32.xlu0 %v712_v50, %s1339_s25 }
 0x1f0   : > { %842 = vrot.lane.b32.xlu1 %v812_v47, %s1345_s30 }
 0x1f2   : > { %788 = vrot.lane.b32.xlu0 %v712_v50, %s1342_s28 }
 0x1f4   : > { %815 = vrot.lane.b32.xlu1 %v1329_v43, %s1344_s29 }
 0x1f6   : > { %859 = vrot.lane.b32.xlu0 %v703_v42, %s1346_s5 }
 0x1f8   : > { %838 = vrot.lane.b32.xlu1 %v1329_v43, %s1345_s30 }
 0x1fa   : > { %865 = vrot.lane.b32.xlu0 %v812_v47, %s1346_s5 }
 0x1fc   : > { %861 = vrot.lane.b32.xlu1 %v1329_v43, %s1346_s5 }
 0x1fe   : > { %886 = vrot.lane.b32.xlu0 %v808_v45, %s1348_s6 }
 0x200   : > { %884 = vrot.lane.b32.xlu1 %v1329_v43, %s1348_s6 }
 0x202   : > { %888 = vrot.lane.b32.xlu0 %v812_v47, %s1348_s6 }
 0x204   : > { %882 = vrot.lane.b32.xlu1 %v703_v42, %s1348_s6 }
 0x206   : > { %1079 = vperm.xlu0 %1321, %v1458_v15  }
 0x208   : > { %1072 = vperm.xlu1 %1320, %v1458_v15  }
 0x238   : > { %v1563_v53 = vpop.permute.xlu0 %817 }
 0x23a   : > { %v714_v54 = vpop.permute.xlu1 %713 }
 0x23c   : > { %v1565_v55 = vpop.permute.xlu0 %840 }
 0x23e   : > { %v760_v56 = vpop.permute.xlu1 %759 }
 0x240   : > { %v1567_v57 = vpop.permute.xlu0 %863 }
 0x242   : > { %v1569_v58 = vpop.permute.xlu1 %813 }
 0x244   : > { %v820_v59 = vpop.permute.xlu0 %819 }
 0x245   : > { %v823_v60 = vsel %vm419_vm5, %v1563_v53, %v820_v59 }
 0x246   : > { %829 = vst [vmem:[#allocation4 + $0x88] sm:$0xf] %v823_v60  ;;  %v1573_v61 = vpop.permute.xlu1 %836 }
 0x248   : > { %v718_v62 = vpop.permute.xlu0 %717 }
 0x24a   : > { %v716_v63 = vpop.permute.xlu1 %715 }
 0x24b   : > { %v721_v15 = vsel %vm315_vm2, %v714_v54, %v716_v63  ;;  %v722_v0 = vsel %vm315_vm2, %v716_v63, %v718_v62 }
 0x24c   : > { %v741_v4 = vpop.permute.xlu0 %740  ;;  %727 = vst [vmem:[#allocation4] sm:$0xf] %v721_v15  ;;  %728 = vst [vmem:[#allocation4 + $0x8] sm:$0xf] %v722_v0  ;;  %v913_v0 = vld [vmem:[#allocation4 + $0x68] sm:$0xff] }
 0x24d   : > { %v917_v63 = vld [vmem:[#allocation4 + $0x88] sm:$0xff] }
 0x24e   : > { %v739_v5 = vpop.permute.xlu1 %738 }
 0x24f   : > { %v745_v6 = vsel %vm339_vm1, %v739_v5, %v741_v4 }
 0x250   : > { %v737_v7 = vpop.permute.xlu0 %736  ;;  %751 = vst [vmem:[#allocation4 + $0x20] sm:$0xf] %v745_v6 }
 0x251   : > { %v744_v9 = vsel %vm339_vm1, %v737_v7, %v739_v5 }
 0x252   : > { %750 = vst [vmem:[#allocation4 + $0x18] sm:$0xf] %v744_v9  ;;  %v720_v10 = vpop.permute.xlu1 %719  ;;  %v914_v9 = vld [vmem:[#allocation4 + $0x70] sm:$0xff] }
 0x253   : > { %v723_v11 = vsel %vm315_vm2, %v718_v62, %v720_v10  ;;  %v901_v19 = vld [vmem:[#allocation4 + $0x8] sm:$0xff]  ;;  %v900_v22 = vld [vmem:[#allocation4] sm:$0xff]  ;;  %v1282_v10 = vpack.c.bf16 %v917_v63, %v914_v9 }
 0x254   : > { %v764_v13 = vpop.permute.xlu0 %763  ;;  %729 = vst [vmem:[#allocation4 + $0x10] sm:$0xf] %v723_v11  ;;  %v912_v62 = vld [vmem:[#allocation4 + $0x60] sm:$0xff] }
 0x256   : > { %v762_v14 = vpop.permute.xlu1 %761 }
 0x257   : > { %v767_v16 = vsel %vm363_vm3, %v760_v56, %v762_v14  ;;  %v768_v17 = vsel %vm363_vm3, %v762_v14, %v764_v13  ;;  %v904_v20 = vld [vmem:[#allocation4 + $0x20] sm:$0xff] }
 0x258   : > { %v787_v18 = vpop.permute.xlu0 %786  ;;  %773 = vst [vmem:[#allocation4 + $0x30] sm:$0xf] %v767_v16  ;;  %774 = vst [vmem:[#allocation4 + $0x38] sm:$0xf] %v768_v17  ;;  %v1259_v21 = vpack.c.bf16 %v904_v20, %v901_v19 }
 0x259   : > { %v903_v23 = vld [vmem:[#allocation4 + $0x18] sm:$0xff] }
 0x25a   : > { %v1261_v24 = vpack.c.bf16 %v903_v23, %v900_v22  ;;  %1260 = vmatprep.subr.bf16.mxu0 %v1259_v21  ;;  %v785_v25 = vpop.permute.xlu1 %784 }
 0x25b   : > { %v791_v26 = vsel %vm387_vm4, %v785_v25, %v787_v18  ;;  %v902_v47 = vld [vmem:[#allocation4 + $0x10] sm:$0xff] }
 0x25c   : > { %v783_v27 = vpop.permute.xlu0 %782  ;;  %1262 = vmatpush1.bf16.msra.mxu0 %v1261_v24  ;;  %797 = vst [vmem:[#allocation4 + $0x50] sm:$0xf] %v791_v26 }
 0x25d   : > { %v790_v28 = vsel %vm387_vm4, %v783_v27, %v785_v25  ;;  %v899_v27 = vld [vmem:[%s1624_s2] sm:$0xf] }
 0x25e   : > { %796 = vst [vmem:[#allocation4 + $0x48] sm:$0xf] %v790_v28  ;;  %v766_v29 = vpop.permute.xlu1 %765 }
 0x25f   : > { %v769_v30 = vsel %vm363_vm3, %v764_v13, %v766_v29  ;;  %v907_v36 = vld [vmem:[#allocation4 + $0x38] sm:$0xff]  ;;  %v906_v40 = vld [vmem:[#allocation4 + $0x30] sm:$0xff] }
 0x260   : > { %v743_v31 = vpop.permute.xlu0 %742  ;;  %775 = vst [vmem:[#allocation4 + $0x40] sm:$0xf] %v769_v30 }
 0x261   : > { %v746_v32 = vsel %vm339_vm1, %v741_v4, %v743_v31  ;;  %vm1635_vm1 = vcmask 900096  }
 0x262   : > { %752 = vst [vmem:[#allocation4 + $0x28] sm:$0xf] %v746_v32  ;;  %v843_v33 = vpop.permute.xlu1 %842  ;;  %vm1636_vm2 = vmmov %vm1635_vm1 }
 0x263   : > { %v846_v34 = vsel %vm443_vm6, %v1565_v55, %v843_v33  ;;  %v910_v37 = vld [vmem:[#allocation4 + $0x50] sm:$0xff]  ;;  %vm1637_vm3 = vmmov %vm1635_vm1 }
 0x264   : > { %v789_v35 = vpop.permute.xlu0 %788  ;;  %852 = vst [vmem:[#allocation4 + $0xa0] sm:$0xf] %v846_v34  ;;  %v1263_v39 = vpack.c.bf16 %v910_v37, %v907_v36 }
 0x265   : > { %v792_v38 = vsel %vm387_vm4, %v787_v18, %v789_v35  ;;  %v909_v41 = vld [vmem:[#allocation4 + $0x48] sm:$0xff]  ;;  %vm1638_vm4 = vcmask 588800  }
 0x266   : > { %798 = vst [vmem:[#allocation4 + $0x58] sm:$0xf] %v792_v38  ;;  %v1265_v42 = vpack.c.bf16 %v909_v41, %v906_v40  ;;  %1264 = vmatprep.subr.bf16.mxu0 %v1263_v39  ;;  %v816_v43 = vpop.permute.xlu1 %815 }
 0x267   : > { %v821_v44 = vsel %vm419_vm5, %v1569_v58, %v816_v43  ;;  %v822_v45 = vsel %vm419_vm5, %v816_v43, %v1563_v53  ;;  %v908_v56 = vld [vmem:[#allocation4 + $0x40] sm:$0xff]  ;;  %vm1639_vm5 = vmmov %vm1638_vm4 }
 0x268   : > { %v860_v46 = vpop.permute.xlu0 %859  ;;  %1266 = vmatpush1.bf16.msra.mxu0 %v1265_v42  ;;  %827 = vst [vmem:[#allocation4 + $0x78] sm:$0xf] %v821_v44  ;;  %828 = vst [vmem:[#allocation4 + $0x80] sm:$0xf] %v822_v45 }
 0x269   : > { %v905_v48 = vld [vmem:[#allocation4 + $0x28] sm:$0xff] }
 0x26a   : > { %v1276_v49 = vpack.c.bf16 %v905_v48, %v902_v47  ;;  %v839_v50 = vpop.permute.xlu1 %838 }
 0x26b   : > { %v844_v51 = vsel %vm443_vm6, %v1573_v61, %v839_v50  ;;  %v845_v52 = vsel %vm443_vm6, %v839_v50, %v1565_v55  ;;  %v920_v16 = vld [vmem:[#allocation4 + $0xa0] sm:$0xff] }
 0x26c   : > { %v866_v54 = vpop.permute.xlu0 %865  ;;  %1277 = vmatpush3.bf16.msra.mxu1 %v1276_v49  ;;  %850 = vst [vmem:[#allocation4 + $0x90] sm:$0xf] %v844_v51  ;;  %851 = vst [vmem:[#allocation4 + $0x98] sm:$0xf] %v845_v52 }
 0x26d   : > { %v869_v53 = vsel %vm467_vm7, %v1567_v57, %v866_v54  ;;  %1278 = vmatprep.subr.bf16.mxu1 %v1343_v8  ;;  %v911_v58 = vld [vmem:[#allocation4 + $0x58] sm:$0xff] }
 0x26e   : > { %875 = vst [vmem:[#allocation4 + $0xb8] sm:$0xf] %v869_v53  ;;  %v1279_v59 = vpack.c.bf16 %v911_v58, %v908_v56  ;;  %v862_v60 = vpop.permute.xlu1 %861 }
 0x26f   : > { %v867_v61 = vsel %vm467_vm7, %v860_v46, %v862_v60  ;;  %v868_v55 = vsel %vm467_vm7, %v862_v60, %v1567_v57  ;;  %v916_v4 = vld [vmem:[#allocation4 + $0x80] sm:$0xff]  ;;  %v915_v5 = vld [vmem:[#allocation4 + $0x78] sm:$0xff] }
 0x270   : > { %v887_v15 = vpop.permute.xlu0 %886  ;;  %1280 = vmatpush3.bf16.msra.mxu1 %v1279_v59  ;;  %873 = vst [vmem:[#allocation4 + $0xa8] sm:$0xf] %v867_v61  ;;  %874 = vst [vmem:[#allocation4 + $0xb0] sm:$0xf] %v868_v55  ;;  %v1267_v6 = vpack.c.bf16 %v916_v4, %v913_v0  ;;  %v1269_v7 = vpack.c.bf16 %v915_v5, %v912_v62 }
 0x271   : > { %1281 = vmatprep.subr.bf16.mxu1 %v1343_v8 }
 0x272   : > { %1268 = vmatprep.subr.bf16.mxu0 %v1267_v6  ;;  %v885_v11 = vpop.permute.xlu1 %884 }
 0x273   : > { %v891_v13 = vsel %vm1635_vm1, %v885_v11, %v887_v15  ;;  %1270 = vmatpush1.bf16.msra.mxu0 %v1269_v7  ;;  %v919_v20 = vld [vmem:[#allocation4 + $0x98] sm:$0xff]  ;;  %v918_v23 = vld [vmem:[#allocation4 + $0x90] sm:$0xff] }
 0x274   : > { %v889_v14 = vpop.permute.xlu0 %888  ;;  %1283 = vmatpush3.bf16.msra.mxu1 %v1282_v10  ;;  %897 = vst [vmem:[#allocation4 + $0xc8] sm:$0xf] %v891_v13 }
 0x275   : > { %v892_v57 = vsel %vm1636_vm2, %v887_v15, %v889_v14  ;;  %1284 = vmatprep.subr.bf16.mxu1 %v1343_v8  ;;  %v923_v17 = vld [vmem:[#allocation4 + $0xb8] sm:$0xff] }
 0x276   : > { %898 = vst [vmem:[#allocation4 + $0xd0] sm:$0xf] %v892_v57  ;;  %v1285_v18 = vpack.c.bf16 %v923_v17, %v920_v16  ;;  %v883_v19 = vpop.permute.xlu1 %882 }
 0x277   : > { %v890_v21 = vsel %vm1637_vm3, %v883_v19, %v885_v11  ;;  %v922_v22 = vld [vmem:[#allocation4 + $0xb0] sm:$0xff]  ;;  %v921_v24 = vld [vmem:[#allocation4 + $0xa8] sm:$0xff] }
 0x278   : > { %1286 = vmatpush3.bf16.msra.mxu1 %v1285_v18  ;;  %896 = vst [vmem:[#allocation4 + $0xc0] sm:$0xf] %v890_v21  ;;  %v1271_v25 = vpack.c.bf16 %v922_v22, %v919_v20  ;;  %v1273_v26 = vpack.c.bf16 %v921_v24, %v918_v23 }
 0x279   : > { %1226 = vmatprep.subr.mxu1 %v1347_v12 }
 0x27a   : > { %1272 = vmatprep.subr.bf16.mxu0 %v1271_v25 }
 0x27b   : > { %1274 = vmatpush1.bf16.msra.mxu0 %v1273_v26  ;;  %v925_v8 = vld [vmem:[#allocation4 + $0xc8] sm:$0xff] }
 0x27c   : > { %946 = vmatprep.subr.mxu0 %v925_v8 }
 0x27d   : > { %v926_v28 = vld [vmem:[#allocation4 + $0xd0] sm:$0xff] }
 0x27e   : > { %1227 = vmatpush3.msra.mxu1 %v926_v28 }
 0x27f   : > { %1229 = vmatmul.mubr.msk.f32.vlgmr.msra.gmra.mrb[2].mxu1 %vm1638_vm4, %v899_v27  ;;  %v924_v29 = vld [vmem:[#allocation4 + $0xc0] sm:$0xff] }
 0x280   : > { %947 = vmatpush1.msra.mxu0 %v924_v29 }
 0x281   : > { %1165 = vmatmul.mubr.msk.f32.vlgmr.msra.gmra.mrb[2].mxu0 %vm1639_vm5, %v899_v27 }
 0x285   : > { %v1080_v12 = vpop.permute.xlu0 %1079 }
 0x287   : > { %v1073_v30 = vpop.permute.xlu1 %1072 }
 0x352   : > { %v1067_v31 = vpop.f32.mrb[2].mxu1 }
 0x353   : > { %v1077_v32 = vmul.f32 %v1073_v30, %v1067_v31  ;;  %v1230_v33 = vpop.f32.mrb[3].mxu1 }
 0x354   : > { %v996_v34 = vpop.f32.mrb[2].mxu0 }
 0x355   : > { %v1084_v35 = vadd.f32 %v1080_v12, %v1077_v32  ;;  %v1075_v36 = vmul.f32 %v1073_v30, %v996_v34  ;;  %v998_v37 = vpop.f32.mrb[3].mxu0 }
 0x356   : > { %v1076_v38 = vmul.f32 %v1073_v30, %v998_v37 }
 0x357   : > { %v1090_v39 = vadd.f32 %v1084_v35, %v1401_v2  ;;  %v1082_v40 = vadd.f32 %v1080_v12, %v1075_v36 }
 0x358   : > { %v1083_v41 = vadd.f32 %v1080_v12, %v1076_v38 }
 0x359   : > { %v1093_v42 = vmax.f32 %v1090_v39, 0.0  ;;  %v1088_v43 = vadd.f32 %v1082_v40, %v1398_v1 }
 0x35a   : > { %v1089_v44 = vadd.f32 %v1083_v41, %v1407_v3 }
 0x35b   : > { %1099 = vst [vmem:[%s1395_s24 + $0x8] sm:$0xf] %v1093_v42  ;;  %v1091_v45 = vmax.f32 %v1088_v43, 0.0 }
 0x35c   : > { %v1092_v46 = vmax.f32 %v1089_v44, 0.0 }
 0x35e   : > { %v1096_v47 = vcombine.low %v1091_v45, %v1092_v46 }
 0x360   : > { %1098 = vst [vmem:[%s1395_s24] sm:$0xff] %v1096_v47 }
 0x361 PF: > { %s14_s15 = sadd.s32 1, %s1336_s15  }
 0x362   : > { %p11_p5 = scmp.ge.s32.totalorder %s14_s15, 4  }
 0x364   :  { %13 = sbr.rel (!%p11_p5) target bundleno = 1 (0x1), region = 70 }

</bundles_post_ra>
